<compile_context>
chip_gen: v7x
topology: tpu7x:2x2x1
jax: 0.10.0
libtpu: 0.0.40
codegen_flags: <defaults>
</compile_context>

<pallas_src>
import functools

import jax
import jax.numpy as jnp
from jax.experimental import pallas as pl
from jax.experimental.pallas import tpu as pltpu


def _label_smoothing_kernel(pred_ref, tgt_ref, out_ref, *,
                            smoothing: float, num_classes: int,
                            total_n: int, block_n: int):
    i = pl.program_id(0)

    # ---- shifted logits + logsumexp along the class (lane) dimension ----
    logits = pred_ref[...].astype(jnp.float32)                      # (bn, C)
    m = jnp.max(logits, axis=-1, keepdims=True)                     # (bn, 1)
    shifted = logits - m                                            # (bn, C)
    lse = jnp.log(jnp.sum(jnp.exp(shifted), axis=-1, keepdims=True))  # (bn, 1)

    # ---- fused smoothed cross entropy ----
    # true_dist sums to 1 per row, so:
    #   sum_c(-true_dist * (shifted - lse)) = lse - sum_c(true_dist * shifted)
    confidence = jnp.float32(1.0 - smoothing)
    off_value = jnp.float32(smoothing / (num_classes - 1))

    tgt = tgt_ref[...]                                              # (bn, 1) int32
    col = jax.lax.broadcasted_iota(jnp.int32, shifted.shape, 1)     # (bn, C)
    w = jnp.where(col == tgt, confidence, off_value)                # (bn, C)
    weighted_sum = jnp.sum(w * shifted, axis=-1, keepdims=True)     # (bn, 1)
    per_row = lse - weighted_sum                                    # (bn, 1)

    # ---- zero out padded rows so the wrapper's sum / N stays exact ----
    row = i * block_n + jax.lax.broadcasted_iota(jnp.int32, per_row.shape, 0)
    per_row = jnp.where(row < total_n, per_row, jnp.float32(0.0))

    out_ref[...] = per_row


def _choose_block_n(n: int, c: int, itemsize: int) -> int:
    """Largest row tile that keeps the pred double-buffer within a VMEM budget."""
    sub = max(8, 32 // max(itemsize, 1))          # 8 for f32, 16 for bf16 packing
    budget = 16 * 1024 * 1024                     # pred: 2 pipeline buffers
    bn = budget // (2 * c * itemsize)
    bn = max(sub, (bn // sub) * sub)
    bn = min(bn, 1024)
    n_pad_min = ((n + sub - 1) // sub) * sub      # never exceed (padded) batch
    return min(bn, n_pad_min)


def label_smoothing_loss(pred, target, *, classes: int, smoothing: float = 0.0,
                         block_n: int | None = None):
    """pred: (N, C) float, target: (N,) int. Returns scalar f32 loss."""
    N, C = pred.shape
    assert C == classes

    itemsize = jnp.dtype(pred.dtype).itemsize
    if block_n is None:
        block_n = _choose_block_n(N, C, itemsize)

    n_blocks = -(-N // block_n)                   # cdiv
    N_pad = n_blocks * block_n

    if N_pad != N:
        pred = jnp.pad(pred, ((0, N_pad - N), (0, 0)))
        target = jnp.pad(target, (0, N_pad - N))
    tgt2d = target.astype(jnp.int32).reshape(N_pad, 1)

    kernel = functools.partial(
        _label_smoothing_kernel,
        smoothing=float(smoothing),
        num_classes=int(classes),
        total_n=int(N),
        block_n=int(block_n),
    )

    per_row = pl.pallas_call(
        kernel,
        out_shape=jax.ShapeDtypeStruct((N_pad, 1), jnp.float32),
        grid_spec=pltpu.PrefetchScalarGridSpec(
            num_scalar_prefetch=0,
            grid=(n_blocks,),
            in_specs=[
                pl.BlockSpec((block_n, C), lambda i: (i, 0)),
                pl.BlockSpec((block_n, 1), lambda i: (i, 0)),
            ],
            out_specs=pl.BlockSpec((block_n, 1), lambda i: (i, 0)),
        ),
        compiler_params=pltpu.CompilerParams(
            # No carried accumulator anymore -> batch axis is fully parallel
            # (lets v7x split grid steps across its two TensorCores).
            dimension_semantics=("parallel",),
            vmem_limit_bytes=32 * 1024 * 1024,
        ),
    )(pred, tgt2d)

    # Final reduction (tiny: N floats) + mean over the *unpadded* batch.
    return jnp.sum(per_row) / jnp.float32(N)


def _reference(pred, target, classes, smoothing):
    logp = jax.nn.log_softmax(pred.astype(jnp.float32), axis=-1)
    confidence = 1.0 - smoothing
    off = smoothing / (classes - 1)
    true_dist = jnp.full(pred.shape, off, jnp.float32)
    true_dist = true_dist.at[jnp.arange(pred.shape[0]), target].set(confidence)
    return jnp.mean(jnp.sum(-true_dist * logp, axis=-1))


if __name__ == "__main__":
    classes = 32
    smoothing = 0.1

    key = jax.random.PRNGKey(0)

    # Case 1: batch divisible by the tile.
    N = 16
    kp, kt, key = (*jax.random.split(key, 2), key)
    pred = jax.random.normal(kp, (N, classes), dtype=jnp.float32)
    target = jax.random.randint(kt, (N,), 0, classes, dtype=jnp.int32)
    loss = jax.block_until_ready(
        label_smoothing_loss(pred, target, classes=classes, smoothing=smoothing))
    ref = _reference(pred, target, classes, smoothing)
    assert jnp.allclose(loss, ref, atol=1e-5, rtol=1e-5), (loss, ref)

    # Case 2: ragged batch (exercises padding + in-kernel row mask).
    N2 = 13
    kp2, kt2 = jax.random.split(jax.random.PRNGKey(1))
    pred2 = jax.random.normal(kp2, (N2, classes), dtype=jnp.float32)
    target2 = jax.random.randint(kt2, (N2,), 0, classes, dtype=jnp.int32)
    loss2 = jax.block_until_ready(
        label_smoothing_loss(pred2, target2, classes=classes, smoothing=smoothing))
    ref2 = _reference(pred2, target2, classes, smoothing)
    assert jnp.allclose(loss2, ref2, atol=1e-5, rtol=1e-5), (loss2, ref2)

    print("KERNEL_OK")
</pallas_src>

<mosaic_0001>
module attributes {stable_mosaic.version = 11 : i64} {
  func.func @_label_smoothing_kernel(%arg0: i32, %arg1: memref<16x32xf32, #tpu.memory_space<vmem>>, %arg2: memref<16x1xi32, #tpu.memory_space<vmem>>, %arg3: memref<16x1xf32, #tpu.memory_space<vmem>>) attributes {dimension_semantics = [#tpu.dimension_semantics<parallel>], iteration_bounds = array<i64: 1>, scalar_prefetch = 0 : i64, scratch_operands = 0 : i64, tpu.core_type = #tpu.core_type<tc>, window_params = [{transform_indices = @transform_0, window_bounds = array<i64: 16, 32>}, {transform_indices = @transform_1, window_bounds = array<i64: 16, 1>}, {transform_indices = @transform_2, window_bounds = array<i64: 16, 1>}]} {
    %c0 = arith.constant 0 : index
    %c0_0 = arith.constant 0 : index
    %0 = vector.load %arg1[%c0, %c0_0] : memref<16x32xf32, #tpu.memory_space<vmem>>, vector<16x32xf32>
    %cst = arith.constant dense<0xFF800000> : vector<16xf32>
    %1 = vector.multi_reduction <maximumf>, %0, %cst [1] : vector<16x32xf32> to vector<16xf32>
    %2 = vector.shape_cast %1 : vector<16xf32> to vector<16x1xf32>
    %3 = vector.broadcast %2 : vector<16x1xf32> to vector<16x32xf32>
    %4 = arith.subf %0, %3 : vector<16x32xf32>
    %5 = math.exp %4 : vector<16x32xf32>
    %cst_1 = arith.constant dense<0.000000e+00> : vector<16xf32>
    %6 = vector.multi_reduction <add>, %5, %cst_1 [1] : vector<16x32xf32> to vector<16xf32>
    %7 = vector.shape_cast %6 : vector<16xf32> to vector<16x1xf32>
    %8 = math.log %7 : vector<16x1xf32>
    %c0_2 = arith.constant 0 : index
    %c0_3 = arith.constant 0 : index
    %9 = vector.load %arg2[%c0_2, %c0_3] : memref<16x1xi32, #tpu.memory_space<vmem>>, vector<16x1xi32>
    %10 = tpu.iota {dimensions = array<i32: 1>} : vector<16x32xi32>
    %11 = vector.broadcast %9 : vector<16x1xi32> to vector<16x32xi32>
    %12 = arith.cmpi eq, %10, %11 : vector<16x32xi32>
    %cst_4 = arith.constant 0.899999976 : f32
    %cst_5 = arith.constant 0.0032258064 : f32
    %13 = vector.broadcast %cst_4 : f32 to vector<16x32xf32>
    %14 = vector.broadcast %cst_5 : f32 to vector<16x32xf32>
    %15 = arith.select %12, %13, %14 : vector<16x32xi1>, vector<16x32xf32>
    %16 = arith.mulf %15, %4 : vector<16x32xf32>
    %cst_6 = arith.constant dense<0.000000e+00> : vector<16xf32>
    %17 = vector.multi_reduction <add>, %16, %cst_6 [1] : vector<16x32xf32> to vector<16xf32>
    %18 = vector.shape_cast %17 : vector<16xf32> to vector<16x1xf32>
    %19 = arith.subf %8, %18 : vector<16x1xf32>
    %c16_i32 = arith.constant 16 : i32
    %20 = arith.muli %arg0, %c16_i32 : i32
    %21 = tpu.iota {dimensions = array<i32: 0>} : vector<16x1xi32>
    %22 = vector.broadcast %20 : i32 to vector<16x1xi32>
    %23 = arith.addi %22, %21 : vector<16x1xi32>
    %c16_i32_7 = arith.constant 16 : i32
    %24 = vector.broadcast %c16_i32_7 : i32 to vector<16x1xi32>
    %25 = arith.cmpi slt, %23, %24 : vector<16x1xi32>
    %cst_8 = arith.constant 0.000000e+00 : f32
    %26 = vector.broadcast %cst_8 : f32 to vector<16x1xf32>
    %27 = arith.select %25, %19, %26 : vector<16x1xi1>, vector<16x1xf32>
    %c0_9 = arith.constant 0 : index
    %c0_10 = arith.constant 0 : index
    %28 = vector.load %arg3[%c0_9, %c0_10] : memref<16x1xf32, #tpu.memory_space<vmem>>, vector<16x1xf32>
    tpu.vector_store %arg3[%c0_9, %c0_10], %27 {strides = array<i32>} : memref<16x1xf32, #tpu.memory_space<vmem>>, vector<16x1xf32>,
    return
  }
  func.func @transform_0(%arg0: i32) -> (i32, i32) {
    %c0_i32 = arith.constant 0 : i32
    %c0_i32_0 = arith.constant 0 : i32
    return %arg0, %c0_i32 : i32, i32
  }
  func.func @transform_1(%arg0: i32) -> (i32, i32) {
    %c0_i32 = arith.constant 0 : i32
    %c0_i32_0 = arith.constant 0 : i32
    return %arg0, %c0_i32 : i32, i32
  }
  func.func @transform_2(%arg0: i32) -> (i32, i32) {
    %c0_i32 = arith.constant 0 : i32
    %c0_i32_0 = arith.constant 0 : i32
    return %arg0, %c0_i32 : i32, i32
  }
}

</mosaic_0001>

<bundles_post_ra>
// kernel: tpu_custom_call.1
= control target key start
LH: loop header
LB: loop body
LE: loop exit
PB: predicated region body
PF: predicated region fallthrough
CT: control target
= control target key end

     0   :  { %vm13_vm0 = vcmask 261120   ;;  %v90_v2 = vmov 0   ;;  %v38_v9 = vlaneseq  ;;  %v91_v17 = vmov 0.0032258064   ;;  %s131_s0 = inlined_call_operand.vmem [shape: f32[16,32], index: 0, kind: input, shape index: {}]   ;;  %s132_s1 = inlined_call_operand.vmem [shape: s32[16,1], index: 1, kind: input, shape index: {}]   ;;  %s133_s2 = inlined_call_operand.vmem [shape: f32[16,1], index: 2, kind: output, shape index: {}]  }
   0x1   :  { %v11_v0 = vld [vmem:[%s131_s0] sm:$0xff]  ;;  %v12_v1 = vld [vmem:[%s131_s0 + $0x8] sm:$0xff]  ;;  %80 = vset.pattern.permute.xlu1 %v90_v2  ;;  %81 = vset.pattern.permute.xlu0 %v90_v2  ;;  %vm71_vm3 = vcmask 7168  }
   0x2   :  { %v36_v3 = vld [vmem:[%s132_s1] sm:$0xff]  ;;  %v14_v4 = vsel %vm13_vm0, %v11_v0, -inf  ;;  %v37_v5 = vld [vmem:[%s132_s1 + $0x8] sm:$0xff]  ;;  %v17_v6 = vsel %vm13_vm0, %v12_v1, -inf  ;;  %v39_v14 = vand.u32 127, %v38_v9 }
   0x3   :  { %41 = vperm.xlu1 %80, %v36_v3   ;;  %15 = vmax.xlane.f32.xlu0 %v14_v4 }
   0x7   :  { %44 = vperm.xlu1 %80, %v37_v5   ;;  %18 = vmax.xlane.f32.xlu0 %v17_v6 }
  0x82   :  { %v42_v12 = vpop.permute.xlu1 %41 }
  0x83   :  { %vm46_vm1 = vcmp.eq.s32.totalorder %v39_v14, %v42_v12 }
  0x84   :  { %v48_v18 = vsel %vm46_vm1, 0.9, %v91_v17 }
  0x86   :  { %v45_v16 = vpop.permute.xlu1 %44 }
  0x87   :  { %vm47_vm2 = vcmp.eq.s32.totalorder %v39_v14, %v45_v16 }
  0x88   :  { %v49_v22 = vsel %vm47_vm2, 0.9, %v91_v17 }
  0x90   :  { %v16_v7 = vpop.xlane.xlu0 %15 }
  0x91   :  { %v20_v8 = vsub.f32 %v11_v0, %v16_v7 }
  0x93   :  { %v22_v10 = vmul.f32 1.442695, %v20_v8  ;;  %v50_v21 = vmul.f32 %v48_v18, %v20_v8 }
  0x94   :  { %v19_v11 = vpop.xlane.xlu0 %18 }
  0x95   :  { %82 = vpow2.f32 %v22_v10  ;;  %v21_v13 = vsub.f32 %v12_v1, %v19_v11  ;;  %v52_v24 = vsel %vm13_vm0, %v50_v21, 0.0 }
  0x97   :  { %v24_v15 = vmul.f32 1.442695, %v21_v13  ;;  %v51_v26 = vmul.f32 %v49_v22, %v21_v13 }
  0x99   :  { %84 = vpow2.f32 %v24_v15  ;;  %v55_v27 = vsel %vm13_vm0, %v51_v26, 0.0 }
  0x9f   :  { %v83_v19 = vpop.eup %82 }
  0xa0   :  { %v26_v20 = vsel %vm13_vm0, %v83_v19, 0.0 }
  0xa1   :  { %27 = vadd.xlane.f32.xlu0 %v26_v20 }
  0xa3   :  { %v85_v23 = vpop.eup %84 }
  0xa4   :  { %v29_v25 = vsel %vm13_vm0, %v85_v23, 0.0 }
  0xa5   :  { %53 = vadd.xlane.f32.xlu0 %v52_v24  ;;  %30 = vadd.xlane.f32.xlu1 %v29_v25 }
  0xa9   :  { %56 = vadd.xlane.f32.xlu0 %v55_v27 }
 0x12e   :  { %v28_v28 = vpop.xlane.xlu0 %27 }
 0x12f   :  { %86 = vlog2.f32 %v28_v28 }
 0x132   :  { %v31_v29 = vpop.xlane.xlu1 %30  ;;  %v54_v31 = vpop.xlane.xlu0 %53 }
 0x133   :  { %88 = vlog2.f32 %v31_v29 }
 0x136   :  { %v57_v36 = vpop.xlane.xlu0 %56 }
 0x139   :  { %v87_v30 = vpop.eup %86 }
 0x13a   :  { %v33_v32 = vmul.f32 0.6931472, %v87_v30 }
 0x13c   :  { %v58_v33 = vsub.f32 %v33_v32, %v54_v31 }
 0x13d   :  { %v89_v34 = vpop.eup %88 }
 0x13e   :  { %72 = vst.msk [vmem:[%s133_s2] sm:$0xff] %vm71_vm3, %v58_v33  ;;  %v35_v35 = vmul.f32 0.6931472, %v89_v34 }
 0x140   :  { %v59_v37 = vsub.f32 %v35_v35, %v57_v36 }
 0x142   :  { %73 = vst.msk [vmem:[%s133_s2 + $0x8] sm:$0xff] %vm71_vm3, %v59_v37 }

</bundles_post_ra>
